<compile_context>
chip_gen: v5e
topology: v5e:2x2
jax: 0.10.0
libtpu: 0.0.40
codegen_flags: <defaults>
</compile_context>

<pallas_src>
import functools

import jax
import jax.numpy as jnp
import numpy as np
from jax.experimental import pallas as pl
from jax.experimental.pallas import tpu as pltpu

NUM_GROUPS = 32
EPS = 1e-6

# Set to jnp.bfloat16 on v6e/v7x for ~2-4x MXU throughput (f32 kept here for
# bit-level parity with the f32 PyTorch reference within 1e-3 tolerances).
MXU_DTYPE = jnp.float32

_CPARAMS = pltpu.CompilerParams(
    dimension_semantics=("parallel",),
    vmem_limit_bytes=64 * 1024 * 1024,
)


# ----------------------------------------------------------------------------
# Kernel 1: per-image, per-channel sum / sum-of-squares (feeds GroupNorm-1)
# ----------------------------------------------------------------------------
def _stats_kernel(x_ref, stat_ref):
    x = x_ref[0].astype(jnp.float32)                      # (H*W, C)
    s = jnp.sum(x, axis=0, keepdims=True)                 # (1, C)
    ss = jnp.sum(x * x, axis=0, keepdims=True)            # (1, C)
    stat_ref[0] = jnp.concatenate([s, ss], axis=0)        # (2, C)


def gn_stats(x_flat):
    N, HW, C = x_flat.shape
    return pl.pallas_call(
        _stats_kernel,
        out_shape=jax.ShapeDtypeStruct((N, 2, C), jnp.float32),
        grid=(N,),
        in_specs=[pl.BlockSpec((1, HW, C), lambda n: (n, 0, 0))],
        out_specs=pl.BlockSpec((1, 2, C), lambda n: (n, 0, 0)),
        compiler_params=_CPARAMS,
    )(x_flat)


def _gn_scale_shift(stats, gamma, beta, hw):
    """Turn per-channel (N,2,C) sums into per-channel affine scale/shift (tiny)."""
    N, _, C = stats.shape
    cg = C // NUM_GROUPS
    cnt = jnp.float32(cg * hw)
    s = stats[:, 0, :].reshape(N, NUM_GROUPS, cg).sum(-1)          # (N, G)
    ss = stats[:, 1, :].reshape(N, NUM_GROUPS, cg).sum(-1)         # (N, G)
    mean = s / cnt
    var = jnp.maximum(ss / cnt - mean * mean, 0.0)                 # guard tiny negatives
    inv = jax.lax.rsqrt(var + EPS)
    mean_c = jnp.repeat(mean, cg, axis=1)                          # (N, C)
    inv_c = jnp.repeat(inv, cg, axis=1)                            # (N, C)
    scale = inv_c * gamma[None, :]
    shift = beta[None, :] - mean_c * scale
    return scale.astype(jnp.float32), shift.astype(jnp.float32)


# ----------------------------------------------------------------------------
# Shared conv body: GroupNorm(scale/shift) + Swish + PeriodicPad + 3x3 conv,
# all in VMEM.  Width taps folded into channels -> 3 matmuls with K = 3*Cin.
# ----------------------------------------------------------------------------
def _normalize_swish_conv(x_ref, scale_ref, shift_ref, w_ref, b_ref, H, W):
    C = x_ref.shape[-1]
    O = w_ref.shape[-1]
    x = x_ref[0].astype(jnp.float32)                               # (H*W, C)
    y = x * scale_ref[...].astype(jnp.float32) + shift_ref[...].astype(jnp.float32)
    y = y * jax.nn.sigmoid(y)                                      # Swish
    y = y.reshape(H, W, C)

    # PeriodicPad2d(1): circular along W (longitude), zeros along H (latitude).
    yw = jnp.concatenate([y[:, W - 1:W, :], y, y[:, 0:1, :]], axis=1)      # (H, W+2, C)
    zrow = jnp.zeros((1, W + 2, C), jnp.float32)
    yp = jnp.concatenate([zrow, yw, zrow], axis=0)                          # (H+2, W+2, C)

    # Fold the 3 width taps into the channel axis -> (H+2, W, 3C).
    ypcat = jnp.concatenate(
        [yp[:, 0:W, :], yp[:, 1:W + 1, :], yp[:, 2:W + 2, :]], axis=-1)

    acc = jnp.zeros((H * W, O), jnp.float32)
    for dh in range(3):                                   # 3 deep-K tap matmuls (MXU)
        a = ypcat[dh:dh + H].reshape(H * W, 3 * C)
        acc = acc + jnp.dot(a.astype(MXU_DTYPE), w_ref[dh],
                            preferred_element_type=jnp.float32)
    return acc + b_ref[...].astype(jnp.float32)


# Kernel 2: GN1+Swish+Pad+Conv1, also emits GN2 per-channel sums while the
# result is still resident in VMEM.
def _gn_swish_conv_kernel(x_ref, scale_ref, shift_ref, w_ref, b_ref,
                          h_ref, stat_ref, *, H, W):
    acc = _normalize_swish_conv(x_ref, scale_ref, shift_ref, w_ref, b_ref, H, W)
    h_ref[0] = acc.astype(h_ref.dtype)
    s = jnp.sum(acc, axis=0, keepdims=True)
    ss = jnp.sum(acc * acc, axis=0, keepdims=True)
    stat_ref[0] = jnp.concatenate([s, ss], axis=0)


# Kernel 3a: GN2+Swish+Pad+Conv2 + identity residual.
def _gn_swish_conv_add_kernel(h_ref, scale_ref, shift_ref, w_ref, b_ref,
                              res_ref, o_ref, *, H, W):
    acc = _normalize_swish_conv(h_ref, scale_ref, shift_ref, w_ref, b_ref, H, W)
    acc = acc + res_ref[0].astype(jnp.float32)
    o_ref[0] = acc.astype(o_ref.dtype)


# Kernel 3b: GN2+Swish+Pad+Conv2 + fused 1x1 channel_up residual.
def _gn_swish_conv_up_kernel(h_ref, scale_ref, shift_ref, w_ref, b_ref,
                             x_ref, upw_ref, upb_ref, o_ref, *, H, W):
    acc = _normalize_swish_conv(h_ref, scale_ref, shift_ref, w_ref, b_ref, H, W)
    res = jnp.dot(x_ref[0].astype(MXU_DTYPE), upw_ref[...],
                  preferred_element_type=jnp.float32)
    acc = acc + res + upb_ref[...].astype(jnp.float32)
    o_ref[0] = acc.astype(o_ref.dtype)


# ----------------------------------------------------------------------------
# pallas_call wrappers
# ----------------------------------------------------------------------------
def _conv_weight(w_pt):
    """(O, Cin, 3, 3) -> (3, 3*Cin, O): w_r[dh, dw*Cin + c, o] = w_pt[o, c, dh, dw]."""
    O, Cin, _, _ = w_pt.shape
    return jnp.transpose(w_pt, (2, 3, 1, 0)).reshape(3, 3 * Cin, O).astype(MXU_DTYPE)


def gn_swish_conv3x3(x_flat, scale, shift, w_pt, b, H, W):
    N, HW, Cin = x_flat.shape
    O = w_pt.shape[0]
    w_r = _conv_weight(w_pt)
    kernel = functools.partial(_gn_swish_conv_kernel, H=H, W=W)
    return pl.pallas_call(
        kernel,
        out_shape=(jax.ShapeDtypeStruct((N, HW, O), x_flat.dtype),
                   jax.ShapeDtypeStruct((N, 2, O), jnp.float32)),
        grid=(N,),
        in_specs=[
            pl.BlockSpec((1, HW, Cin), lambda n: (n, 0, 0)),
            pl.BlockSpec((1, Cin), lambda n: (n, 0)),
            pl.BlockSpec((1, Cin), lambda n: (n, 0)),
            pl.BlockSpec((3, 3 * Cin, O), lambda n: (0, 0, 0)),
            pl.BlockSpec((1, O), lambda n: (0, 0)),
        ],
        out_specs=(pl.BlockSpec((1, HW, O), lambda n: (n, 0, 0)),
                   pl.BlockSpec((1, 2, O), lambda n: (n, 0, 0))),
        compiler_params=_CPARAMS,
    )(x_flat, scale, shift, w_r, b.reshape(1, O))


def gn_swish_conv3x3_add(h_flat, scale, shift, w_pt, b, res_flat, H, W):
    N, HW, C = h_flat.shape
    O = w_pt.shape[0]
    w_r = _conv_weight(w_pt)
    kernel = functools.partial(_gn_swish_conv_add_kernel, H=H, W=W)
    return pl.pallas_call(
        kernel,
        out_shape=jax.ShapeDtypeStruct((N, HW, O), h_flat.dtype),
        grid=(N,),
        in_specs=[
            pl.BlockSpec((1, HW, C), lambda n: (n, 0, 0)),
            pl.BlockSpec((1, C), lambda n: (n, 0)),
            pl.BlockSpec((1, C), lambda n: (n, 0)),
            pl.BlockSpec((3, 3 * C, O), lambda n: (0, 0, 0)),
            pl.BlockSpec((1, O), lambda n: (0, 0)),
            pl.BlockSpec((1, HW, O), lambda n: (n, 0, 0)),
        ],
        out_specs=pl.BlockSpec((1, HW, O), lambda n: (n, 0, 0)),
        compiler_params=_CPARAMS,
    )(h_flat, scale, shift, w_r, b.reshape(1, O), res_flat)


def gn_swish_conv3x3_up(h_flat, scale, shift, w_pt, b, x_flat, up_w, up_b, H, W):
    N, HW, C = h_flat.shape
    Cin = x_flat.shape[-1]
    O = w_pt.shape[0]
    w_r = _conv_weight(w_pt)
    upw = jnp.transpose(up_w.reshape(O, Cin), (1, 0)).astype(MXU_DTYPE)   # (Cin, O)
    kernel = functools.partial(_gn_swish_conv_up_kernel, H=H, W=W)
    return pl.pallas_call(
        kernel,
        out_shape=jax.ShapeDtypeStruct((N, HW, O), h_flat.dtype),
        grid=(N,),
        in_specs=[
            pl.BlockSpec((1, HW, C), lambda n: (n, 0, 0)),
            pl.BlockSpec((1, C), lambda n: (n, 0)),
            pl.BlockSpec((1, C), lambda n: (n, 0)),
            pl.BlockSpec((3, 3 * C, O), lambda n: (0, 0, 0)),
            pl.BlockSpec((1, O), lambda n: (0, 0)),
            pl.BlockSpec((1, HW, Cin), lambda n: (n, 0, 0)),
            pl.BlockSpec((Cin, O), lambda n: (0, 0)),
            pl.BlockSpec((1, O), lambda n: (0, 0)),
        ],
        out_specs=pl.BlockSpec((1, HW, O), lambda n: (n, 0, 0)),
        compiler_params=_CPARAMS,
    )(h_flat, scale, shift, w_r, b.reshape(1, O), x_flat, upw, up_b.reshape(1, O))


# ----------------------------------------------------------------------------
# ResidualBlock forward
# ----------------------------------------------------------------------------
def residual_block_nhwc(x_nhwc, params):
    """NHWC in / NHWC out — preferred entry point when stacking blocks."""
    N, H, W, Cin = x_nhwc.shape
    Cout = params["out_channels"]
    x = x_nhwc.reshape(N, H * W, Cin)

    st1 = gn_stats(x)
    scale1, shift1 = _gn_scale_shift(st1, params["gn1_gamma"], params["gn1_beta"], H * W)
    h1, st2 = gn_swish_conv3x3(x, scale1, shift1, params["conv1_w"], params["conv1_b"], H, W)
    scale2, shift2 = _gn_scale_shift(st2, params["gn2_gamma"], params["gn2_beta"], H * W)

    if params["in_channels"] != Cout:
        out = gn_swish_conv3x3_up(h1, scale2, shift2, params["conv2_w"], params["conv2_b"],
                                  x, params["up_w"], params["up_b"], H, W)
    else:
        out = gn_swish_conv3x3_add(h1, scale2, shift2, params["conv2_w"], params["conv2_b"],
                                   x, H, W)
    return out.reshape(N, H, W, Cout)


def residual_block(x_nchw, params):
    """NCHW in / NCHW out (matches the PyTorch module exactly)."""
    x = jnp.transpose(x_nchw, (0, 2, 3, 1))           # NCHW -> NHWC (boundary only)
    out = residual_block_nhwc(x, params)
    return jnp.transpose(out, (0, 3, 1, 2))           # NHWC -> NCHW


# ----------------------------------------------------------------------------
# Pure-JAX reference (mirrors the PyTorch module) for verification.
# ----------------------------------------------------------------------------
def _ref_gn_swish(x, gamma, beta):                    # x: NCHW
    N, C, H, W = x.shape
    xg = x.reshape(N, NUM_GROUPS, (C // NUM_GROUPS) * H * W)
    mean = xg.mean(-1, keepdims=True)
    var = xg.var(-1, keepdims=True)
    xn = ((xg - mean) / jnp.sqrt(var + EPS)).reshape(N, C, H, W)
    y = xn * gamma.reshape(1, C, 1, 1) + beta.reshape(1, C, 1, 1)
    return y * jax.nn.sigmoid(y)


def _ref_pad(x):                                      # x: NCHW
    x = jnp.pad(x, ((0, 0), (0, 0), (0, 0), (1, 1)), mode="wrap")
    return jnp.pad(x, ((0, 0), (0, 0), (1, 1), (0, 0)), mode="constant")


def _ref_conv(x, w, b):
    y = jax.lax.conv_general_dilated(
        x, w, (1, 1), "VALID", dimension_numbers=("NCHW", "OIHW", "NCHW"))
    return y + b.reshape(1, -1, 1, 1)


def _ref_residual_block(x, p):
    h = _ref_gn_swish(x, p["gn1_gamma"], p["gn1_beta"])
    h = _ref_conv(_ref_pad(h), p["conv1_w"], p["conv1_b"])
    h = _ref_gn_swish(h, p["gn2_gamma"], p["gn2_beta"])
    h = _ref_conv(_ref_pad(h), p["conv2_w"], p["conv2_b"])
    res = x if p["in_channels"] == p["out_channels"] else _ref_conv(x, p["up_w"], p["up_b"])
    return h + res


# ----------------------------------------------------------------------------
def make_params(cin, cout, key):
    ks = jax.random.split(key, 10)
    return {
        "in_channels": cin,
        "out_channels": cout,
        "gn1_gamma": 1.0 + 0.1 * jax.random.normal(ks[0], (cin,), jnp.float32),
        "gn1_beta": 0.1 * jax.random.normal(ks[1], (cin,), jnp.float32),
        "conv1_w": 0.05 * jax.random.normal(ks[2], (cout, cin, 3, 3), jnp.float32),
        "conv1_b": 0.05 * jax.random.normal(ks[3], (cout,), jnp.float32),
        "gn2_gamma": 1.0 + 0.1 * jax.random.normal(ks[4], (cout,), jnp.float32),
        "gn2_beta": 0.1 * jax.random.normal(ks[5], (cout,), jnp.float32),
        "conv2_w": 0.05 * jax.random.normal(ks[6], (cout, cout, 3, 3), jnp.float32),
        "conv2_b": 0.05 * jax.random.normal(ks[7], (cout,), jnp.float32),
        "up_w": 0.05 * jax.random.normal(ks[8], (cout, cin, 1, 1), jnp.float32),
        "up_b": 0.05 * jax.random.normal(ks[9], (cout,), jnp.float32),
    }


if __name__ == "__main__":
    # GroupNorm has 32 groups, so channels must be multiples of 32.
    key = jax.random.PRNGKey(0)
    for cin, cout in ((32, 64), (32, 32)):            # channel_up path and identity path
        key, kx, kp = jax.random.split(key, 3)
        x = jax.random.normal(kx, (2, cin, 16, 16), jnp.float32)
        params = make_params(cin, cout, kp)

        out = jax.block_until_ready(residual_block(x, params))
        assert out.shape == (2, cout, 16, 16)

        ref = jax.block_until_ready(_ref_residual_block(x, params))
        np.testing.assert_allclose(np.asarray(out), np.asarray(ref), rtol=1e-3, atol=1e-3)

    print("KERNEL_OK")
</pallas_src>

<mosaic_0001>
module attributes {stable_mosaic.version = 11 : i64} {
  func.func @_stats_kernel(%arg0: i32, %arg1: memref<1x256x32xf32, #tpu.memory_space<vmem>>, %arg2: memref<1x2x32xf32, #tpu.memory_space<vmem>>) attributes {dimension_semantics = [#tpu.dimension_semantics<parallel>], iteration_bounds = array<i64: 2>, scalar_prefetch = 0 : i64, scratch_operands = 0 : i64, tpu.core_type = #tpu.core_type<tc>, window_params = [{transform_indices = @transform_0, window_bounds = array<i64: 1, 256, 32>}, {transform_indices = @transform_1, window_bounds = array<i64: 1, 2, 32>}]} {
    %c0 = arith.constant 0 : index
    %c0_0 = arith.constant 0 : index
    %c0_1 = arith.constant 0 : index
    %0 = vector.load %arg1[%c0, %c0_0, %c0_1] : memref<1x256x32xf32, #tpu.memory_space<vmem>>, vector<1x256x32xf32>
    %1 = vector.shape_cast %0 : vector<1x256x32xf32> to vector<256x32xf32>
    %cst = arith.constant dense<0.000000e+00> : vector<32xf32>
    %2 = vector.multi_reduction <add>, %1, %cst [0] : vector<256x32xf32> to vector<32xf32>
    %3 = vector.shape_cast %2 : vector<32xf32> to vector<1x32xf32>
    %4 = arith.mulf %1, %1 : vector<256x32xf32>
    %cst_2 = arith.constant dense<0.000000e+00> : vector<32xf32>
    %5 = vector.multi_reduction <add>, %4, %cst_2 [0] : vector<256x32xf32> to vector<32xf32>
    %6 = vector.shape_cast %5 : vector<32xf32> to vector<1x32xf32>
    %7 = tpu.concatenate %3, %6 in 0 : vector<1x32xf32>, vector<1x32xf32> -> vector<2x32xf32>
    %c0_3 = arith.constant 0 : index
    %c0_4 = arith.constant 0 : index
    %c0_5 = arith.constant 0 : index
    %8 = vector.load %arg2[%c0_3, %c0_4, %c0_5] : memref<1x2x32xf32, #tpu.memory_space<vmem>>, vector<1x2x32xf32>
    %9 = vector.shape_cast %8 : vector<1x2x32xf32> to vector<2x32xf32>
    %10 = vector.shape_cast %7 : vector<2x32xf32> to vector<1x2x32xf32>
    tpu.vector_store %arg2[%c0_3, %c0_4, %c0_5], %10 {strides = array<i32>} : memref<1x2x32xf32, #tpu.memory_space<vmem>>, vector<1x2x32xf32>,
    return
  }
  func.func @transform_0(%arg0: i32) -> (i32, i32, i32) {
    %c0_i32 = arith.constant 0 : i32
    %c0_i32_0 = arith.constant 0 : i32
    %c0_i32_1 = arith.constant 0 : i32
    return %arg0, %c0_i32, %c0_i32_0 : i32, i32, i32
  }
  func.func @transform_1(%arg0: i32) -> (i32, i32, i32) {
    %c0_i32 = arith.constant 0 : i32
    %c0_i32_0 = arith.constant 0 : i32
    %c0_i32_1 = arith.constant 0 : i32
    return %arg0, %c0_i32, %c0_i32_0 : i32, i32, i32
  }
}

</mosaic_0001>

<bundles_post_ra>
// kernel: tpu_custom_call.1
= control target key start
LH: loop header
LB: loop body
LE: loop exit
PB: predicated region body
PF: predicated region fallthrough
CT: control target
= control target key end

     0   :  { %6 = vsyncpa [#allocation3], 0  ;;  %s705_s0 = inlined_call_operand.vmem [shape: f32[2,256,32], index: 0, kind: input, shape index: {}]   ;;  %s706_s1 = inlined_call_operand.hbm [shape: f32[2,2,32], index: 1, kind: output, shape index: {}]  }
   0x1   :  { %8 = vsyncpa [#allocation3 + $0x1], 0  ;;  %s522_s6 = smov 0   ;;  %s524_s7 = smov 0  }
   0x2   :  { %s526_s8 = smov 0   ;;  %s528_s9 = smov 0  }
   0x3 LB: > { %s543_s10 = sadd.s32 4294967295, %s510_s9   ;;  %s397_s11 = sadd.s32 4294967294, %s510_s9   ;;  %s510_s9 = sphi %s528_s9, %s712_s9   ;;  %s506_s8 = sphi %s526_s8, %s711_s8   ;;  %s502_s7 = sphi %s524_s7, %s710_s7   ;;  %s498_s6 = sphi %s522_s6, %s709_s6  }
   0x4   : > { %s547_s12 = sadd.s32 1, %s510_s9   ;;  %s47_s13 = sadd.s32 1, %s506_s8 }
   0x5   : > { %s44_s14 = ssub.s32 %s510_s9, %s547_s12  ;;  %p57_p0 = scmp.ne.s32.totalorder %s506_s8, %s502_s7 }
   0x6   : > { %p45_p1 = scmp.eq.s32.totalorder %s44_s14, 0  ;;  %p58_p2 = scmp.eq.s32.totalorder %s543_s10, 1 }
   0x7   : > { %p63_p3 = scmp.ne.s32.totalorder %s502_s7, %s498_s6  ;;  %p64_p4 = scmp.eq.s32.totalorder %s397_s11, 1 }
   0x8   : > { %s558_s15 = scalar_select %p45_p1, %s506_s8, %s47_s13  }
   0x9   : > { %p560_p5 = por %p58_p2, %p57_p0  ;;  %p564_p6 = por %p64_p4, %p63_p3 }
   0xa   : > { %p400_p7 = scmp.ge.s32.totalorder %s510_s9, 1  ;;  %p90_p8 = scmp.lt.s32.totalorder %s510_s9, 3 }
   0xc   : > { %p91_p9 = pnand %p400_p7, %p90_p8 }
   0xd   : > { %p110_p10 = scmp.lt.s32.totalorder (!%p91_p9), %s543_s10, 1  ;;  %s107_s23 = sand.u32 (!%p91_p9), 1, %s502_s7  }
   0xe   : > { %94 = sbr.rel (%p91_p9) target bundleno = 107 (0x6b), region = 24  ;;  %s401_s24 = sshll.u32 (!%p91_p9), %s107_s23, 1 }
   0xf   : > { %s405_s25 = sshll.u32 (!%p91_p9), %s543_s10, 1  ;;  %s109_s29 = scalar_lea.vmem (!%p91_p9), [#allocation2], %s401_s24 }
  0x10   : > { %s333_s28 = scalar_lea.hbm (!%p91_p9), %s706_s1, %s405_s25  ;;  %s335_s30 = sshll.u32 (!%p91_p9), %s109_s29, 4  ;;  %s336_s30 = int_to_ptr.vmem [resolvable:$true] %s335_s30 }
  0x11   : > { %s337_s2 = sshll.u32 (!%p91_p9), %s333_s28, 4  ;;  %s323_s3 = scalar_lea.sflag (!%p91_p9), [#allocation3], %s107_s23  ;;  %s338_s2 = int_to_ptr.hbm [resolvable:$true] %s337_s2 }
  0x12   : > { %s462_s4 = sshra.s32 (!%p91_p9), %s338_s2, 4  ;;  %s468_s13 = scalar_lea.hbm (!%p91_p9), %s706_s1, 4  ;;  %s463_s4 = int_to_ptr.hbm [resolvable:$true] %s462_s4 }
  0x13   : > { %s111_s18 = scalar_select %p110_p10, %s543_s10, 1  ;;  %vm147_vm0 = vcmask 261120   ;;  %vm318_vm1 = vcmask 1040384   ;;  %vm320_vm2 = vcmask 254976  }
  0x14   : > { %s464_s5 = scalar_lea.hbm %s463_s4, 2  ;;  %p469_p0 = scmp.lt.s32.totalorder %s463_s4, %s706_s1 }
  0x15   : > { %s408_s19 = sshll.u32 %s111_s18, 8  ;;  %p465_p11 = scmp.ne.s32.totalorder %s463_s4, %s464_s5 }
  0x16   : > { %s575_s22 = scalar_lea.vmem %s705_s0, %s408_s19  ;;  %p470_p1 = scmp.lt.s32.totalorder %s468_s13, %s464_s5 }
  0x17   : > { %v115_v0 = vld [vmem:[%s575_s22] sm:$0xff]  ;;  %v116_v1 = vld [vmem:[%s575_s22 + $0x8] sm:$0xff]  ;;  %v117_v2 = vld [vmem:[%s575_s22 + $0x10] sm:$0xff]  ;;  %p466_p12 = pnand %p465_p11, %p560_p5 }
  0x18   : > { %v148_v3 = vsel %vm147_vm0, %v115_v0, 0.0  ;;  %v149_v4 = vsel %vm147_vm0, %v116_v1, 0.0  ;;  %v151_v5 = vsel %vm147_vm0, %v117_v2, 0.0  ;;  %v118_v6 = vld [vmem:[%s575_s22 + $0x18] sm:$0xff]  ;;  %v119_v9 = vld [vmem:[%s575_s22 + $0x20] sm:$0xff]  ;;  %v120_v12 = vld [vmem:[%s575_s22 + $0x28] sm:$0xff]  ;;  %v217_v20 = vmul.f32 %v115_v0, %v115_v0  ;;  %p471_p2 = por %p470_p1, %p469_p0 }
  0x19   : > { %v150_v7 = vadd.f32 %v149_v4, %v148_v3  ;;  %v153_v8 = vsel %vm147_vm0, %v118_v6, 0.0  ;;  %v155_v11 = vsel %vm147_vm0, %v119_v9, 0.0  ;;  %v157_v14 = vsel %vm147_vm0, %v120_v12, 0.0  ;;  %v121_v15 = vld [vmem:[%s575_s22 + $0x30] sm:$0xff]  ;;  %v122_v18 = vld [vmem:[%s575_s22 + $0x38] sm:$0xff]  ;;  %v123_v24 = vld [vmem:[%s575_s22 + $0x40] sm:$0xff]  ;;  %p467_p13 = pneg %p466_p12 }
  0x1a   : > { %v159_v17 = vsel %vm147_vm0, %v121_v15, 0.0  ;;  %v161_v21 = vsel %vm147_vm0, %v122_v18, 0.0  ;;  %v218_v22 = vmul.f32 %v116_v1, %v116_v1  ;;  %v219_v23 = vmul.f32 %v117_v2, %v117_v2  ;;  %v124_v28 = vld [vmem:[%s575_s22 + $0x48] sm:$0xff]  ;;  %v125_v35 = vld [vmem:[%s575_s22 + $0x50] sm:$0xff]  ;;  %v126_v41 = vld [vmem:[%s575_s22 + $0x58] sm:$0xff] }
  0x1b   : > { %v152_v10 = vadd.f32 %v151_v5, %v150_v7  ;;  %v163_v26 = vsel %vm147_vm0, %v123_v24, 0.0  ;;  %v220_v27 = vmul.f32 %v118_v6, %v118_v6  ;;  %v249_v30 = vsel %vm147_vm0, %v217_v20, 0.0  ;;  %v127_v47 = vld [vmem:[%s575_s22 + $0x60] sm:$0xff]  ;;  %v128_v53 = vld [vmem:[%s575_s22 + $0x68] sm:$0xff]  ;;  %v129_v59 = vld [vmem:[%s575_s22 + $0x70] sm:$0xff]  ;;  %p472_p3 = pnand %p471_p2, %p467_p13 }
  0x1c   : > { %v165_v31 = vsel %vm147_vm0, %v124_v28, 0.0  ;;  %v221_v32 = vmul.f32 %v119_v9, %v119_v9  ;;  %v250_v33 = vsel %vm147_vm0, %v218_v22, 0.0  ;;  %v252_v34 = vsel %vm147_vm0, %v219_v23, 0.0  ;;  %v130_v1 = vld [vmem:[%s575_s22 + $0x78] sm:$0xff]  ;;  %v131_v7 = vld [vmem:[%s575_s22 + $0x80] sm:$0xff] }
  0x1d   : > { %v154_v13 = vadd.f32 %v153_v8, %v152_v10  ;;  %v251_v37 = vadd.f32 %v250_v33, %v249_v30  ;;  %v167_v38 = vsel %vm147_vm0, %v125_v35, 0.0  ;;  %v222_v39 = vmul.f32 %v120_v12, %v120_v12 }
  0x1e   : > { %v254_v40 = vsel %vm147_vm0, %v220_v27, 0.0  ;;  %v169_v44 = vsel %vm147_vm0, %v126_v41, 0.0  ;;  %v223_v45 = vmul.f32 %v121_v15, %v121_v15  ;;  %v256_v46 = vsel %vm147_vm0, %v221_v32, 0.0 }
  0x1f   : > { %v156_v16 = vadd.f32 %v155_v11, %v154_v13  ;;  %v253_v43 = vadd.f32 %v252_v34, %v251_v37  ;;  %v171_v50 = vsel %vm147_vm0, %v127_v47, 0.0  ;;  %v224_v51 = vmul.f32 %v122_v18, %v122_v18  ;;  %v132_v13 = vld [vmem:[%s575_s22 + $0x88] sm:$0xff] }
  0x20   : > { %v258_v52 = vsel %vm147_vm0, %v222_v39, 0.0  ;;  %v173_v56 = vsel %vm147_vm0, %v128_v53, 0.0  ;;  %v225_v57 = vmul.f32 %v123_v24, %v123_v24  ;;  %v260_v58 = vsel %vm147_vm0, %v223_v45, 0.0  ;;  %v136_v37 = vld [vmem:[%s575_s22 + $0xa8] sm:$0xff] }
  0x21   : > { %v158_v19 = vadd.f32 %v157_v14, %v156_v16  ;;  %v255_v49 = vadd.f32 %v254_v40, %v253_v43  ;;  %v175_v62 = vsel %vm147_vm0, %v129_v59, 0.0  ;;  %v226_v63 = vmul.f32 %v124_v28, %v124_v28  ;;  %v137_v43 = vld [vmem:[%s575_s22 + $0xb0] sm:$0xff] }
  0x22   : > { %v262_v0 = vsel %vm147_vm0, %v224_v51, 0.0  ;;  %v177_v4 = vsel %vm147_vm0, %v130_v1, 0.0  ;;  %v227_v5 = vmul.f32 %v125_v35, %v125_v35  ;;  %v264_v6 = vsel %vm147_vm0, %v225_v57, 0.0 }
  0x23   : > { %v160_v25 = vadd.f32 %v159_v17, %v158_v19  ;;  %v257_v55 = vadd.f32 %v256_v46, %v255_v49  ;;  %v179_v10 = vsel %vm147_vm0, %v131_v7, 0.0  ;;  %v228_v11 = vmul.f32 %v126_v41, %v126_v41  ;;  %v133_v19 = vld [vmem:[%s575_s22 + $0x90] sm:$0xff]  ;;  %v138_v49 = vld [vmem:[%s575_s22 + $0xb8] sm:$0xff] }
  0x24   : > { %v266_v12 = vsel %vm147_vm0, %v226_v63, 0.0  ;;  %v181_v16 = vsel %vm147_vm0, %v132_v13, 0.0  ;;  %v229_v17 = vmul.f32 %v127_v47, %v127_v47  ;;  %v268_v18 = vsel %vm147_vm0, %v227_v5, 0.0 }
  0x25   : > { %v162_v29 = vadd.f32 %v161_v21, %v160_v25  ;;  %v259_v61 = vadd.f32 %v258_v52, %v257_v55  ;;  %v183_v22 = vsel %vm147_vm0, %v133_v19, 0.0  ;;  %v230_v23 = vmul.f32 %v128_v53, %v128_v53  ;;  %v134_v25 = vld [vmem:[%s575_s22 + $0x98] sm:$0xff]  ;;  %v139_v55 = vld [vmem:[%s575_s22 + $0xc0] sm:$0xff] }
  0x26   : > { %v270_v24 = vsel %vm147_vm0, %v228_v11, 0.0  ;;  %v185_v28 = vsel %vm147_vm0, %v134_v25, 0.0  ;;  %v272_v30 = vsel %vm147_vm0, %v229_v17, 0.0  ;;  %v232_v35 = vmul.f32 %v130_v1, %v130_v1 }
  0x27   : > { %v164_v36 = vadd.f32 %v163_v26, %v162_v29  ;;  %v261_v3 = vadd.f32 %v260_v58, %v259_v61  ;;  %v231_v29 = vmul.f32 %v129_v59, %v129_v59  ;;  %v189_v40 = vsel %vm147_vm0, %v136_v37, 0.0  ;;  %v140_v61 = vld [vmem:[%s575_s22 + $0xc8] sm:$0xff] }
  0x28   : > { %v233_v41 = vmul.f32 %v131_v7, %v131_v7  ;;  %v191_v46 = vsel %vm147_vm0, %v137_v43, 0.0  ;;  %v234_v47 = vmul.f32 %v132_v13, %v132_v13  ;;  %v193_v52 = vsel %vm147_vm0, %v138_v49, 0.0 }
  0x29   : > { %v166_v42 = vadd.f32 %v165_v31, %v164_v36  ;;  %v263_v9 = vadd.f32 %v262_v0, %v261_v3  ;;  %v135_v31 = vld [vmem:[%s575_s22 + $0xa0] sm:$0xff]  ;;  %v274_v36 = vsel %vm147_vm0, %v230_v23, 0.0  ;;  %v235_v53 = vmul.f32 %v133_v19, %v133_v19  ;;  %v141_v3 = vld [vmem:[%s575_s22 + $0xd0] sm:$0xff] }
  0x2a   : > { %v187_v34 = vsel %vm147_vm0, %v135_v31, 0.0  ;;  %v195_v58 = vsel %vm147_vm0, %v139_v55, 0.0  ;;  %v236_v59 = vmul.f32 %v134_v25, %v134_v25  ;;  %v197_v0 = vsel %vm147_vm0, %v140_v61, 0.0 }
  0x2b   : > { %v168_v48 = vadd.f32 %v167_v38, %v166_v42  ;;  %v265_v15 = vadd.f32 %v264_v6, %v263_v9  ;;  %v276_v42 = vsel %vm147_vm0, %v231_v29, 0.0  ;;  %v237_v1 = vmul.f32 %v135_v31, %v135_v31  ;;  %v142_v9 = vld [vmem:[%s575_s22 + $0xd8] sm:$0xff] }
  0x2c   : > { %v199_v6 = vsel %vm147_vm0, %v141_v3, 0.0  ;;  %v238_v7 = vmul.f32 %v136_v37, %v136_v37  ;;  %v239_v13 = vmul.f32 %v137_v43, %v137_v43  ;;  %v240_v19 = vmul.f32 %v138_v49, %v138_v49 }
  0x2d   : > { %v170_v54 = vadd.f32 %v169_v44, %v168_v48  ;;  %v267_v21 = vadd.f32 %v266_v12, %v265_v15  ;;  %v278_v48 = vsel %vm147_vm0, %v232_v35, 0.0  ;;  %v201_v12 = vsel %vm147_vm0, %v142_v9, 0.0  ;;  %v143_v15 = vld [vmem:[%s575_s22 + $0xe0] sm:$0xff] }
  0x2e   : > { %v241_v25 = vmul.f32 %v139_v55, %v139_v55  ;;  %v242_v31 = vmul.f32 %v140_v61, %v140_v61  ;;  %v243_v37 = vmul.f32 %v141_v3, %v141_v3 }
  0x2f   : > { %v172_v60 = vadd.f32 %v171_v50, %v170_v54  ;;  %v269_v27 = vadd.f32 %v268_v18, %v267_v21  ;;  %v280_v54 = vsel %vm147_vm0, %v233_v41, 0.0  ;;  %v203_v18 = vsel %vm147_vm0, %v143_v15, 0.0  ;;  %v144_v21 = vld [vmem:[%s575_s22 + $0xe8] sm:$0xff] }
  0x30   : > { %v244_v41 = vmul.f32 %v142_v9, %v142_v9 }
  0x31   : > { %v174_v2 = vadd.f32 %v173_v56, %v172_v60  ;;  %v271_v33 = vadd.f32 %v270_v24, %v269_v27  ;;  %v282_v60 = vsel %vm147_vm0, %v234_v47, 0.0  ;;  %v205_v24 = vsel %vm147_vm0, %v144_v21, 0.0  ;;  %v145_v27 = vld [vmem:[%s575_s22 + $0xf0] sm:$0xff] }
  0x32   : > { %v302_v49 = vsel %vm147_vm0, %v244_v41, 0.0 }
  0x33   : > { %v176_v8 = vadd.f32 %v175_v62, %v174_v2  ;;  %v273_v39 = vadd.f32 %v272_v30, %v271_v33  ;;  %v284_v2 = vsel %vm147_vm0, %v235_v53, 0.0  ;;  %v207_v30 = vsel %vm147_vm0, %v145_v27, 0.0  ;;  %v146_v33 = vld [vmem:[%s575_s22 + $0xf8] sm:$0xff] }
  0x34   : > { %v248_v55 = vmul.f32 %v146_v33, %v146_v33 }
  0x35   : > { %v178_v14 = vadd.f32 %v177_v4, %v176_v8  ;;  %v275_v45 = vadd.f32 %v274_v36, %v273_v39  ;;  %v286_v8 = vsel %vm147_vm0, %v236_v59, 0.0  ;;  %v209_v36 = vsel %vm147_vm0, %v146_v33, 0.0 }
  0x36   : > { %v310_v61 = vsel %vm147_vm0, %v248_v55, 0.0 }
  0x37   : > { %v180_v20 = vadd.f32 %v179_v10, %v178_v14  ;;  %v277_v51 = vadd.f32 %v276_v42, %v275_v45  ;;  %v288_v14 = vsel %vm147_vm0, %v237_v1, 0.0  ;;  %v298_v42 = vsel %vm147_vm0, %v242_v31, 0.0 }
  0x38   : > { %v245_v45 = vmul.f32 %v143_v15, %v143_v15 }
  0x39   : > { %v182_v26 = vadd.f32 %v181_v16, %v180_v20  ;;  %v279_v57 = vadd.f32 %v278_v48, %v277_v51  ;;  %v290_v20 = vsel %vm147_vm0, %v238_v7, 0.0  ;;  %v246_v48 = vmul.f32 %v144_v21, %v144_v21 }
  0x3a   : > { %v304_v53 = vsel %vm147_vm0, %v245_v45, 0.0 }
  0x3b   : > { %v184_v32 = vadd.f32 %v183_v22, %v182_v26  ;;  %v281_v63 = vadd.f32 %v280_v54, %v279_v57  ;;  %v292_v26 = vsel %vm147_vm0, %v239_v13, 0.0 }
  0x3d   : > { %v186_v38 = vadd.f32 %v185_v28, %v184_v32  ;;  %v283_v5 = vadd.f32 %v282_v60, %v281_v63  ;;  %v294_v32 = vsel %vm147_vm0, %v240_v19, 0.0 }
  0x3f   : > { %v188_v44 = vadd.f32 %v187_v34, %v186_v38  ;;  %v285_v11 = vadd.f32 %v284_v2, %v283_v5  ;;  %v296_v38 = vsel %vm147_vm0, %v241_v25, 0.0 }
  0x41   : > { %v190_v50 = vadd.f32 %v189_v40, %v188_v44  ;;  %v287_v17 = vadd.f32 %v286_v8, %v285_v11 }
  0x43   : > { %v192_v56 = vadd.f32 %v191_v46, %v190_v50  ;;  %v289_v23 = vadd.f32 %v288_v14, %v287_v17  ;;  %v300_v46 = vsel %vm147_vm0, %v243_v37, 0.0 }
  0x45   : > { %v194_v62 = vadd.f32 %v193_v52, %v192_v56  ;;  %v291_v29 = vadd.f32 %v290_v20, %v289_v23  ;;  %v247_v52 = vmul.f32 %v145_v27, %v145_v27  ;;  %v306_v56 = vsel %vm147_vm0, %v246_v48, 0.0 }
  0x47   : > { %v196_v4 = vadd.f32 %v195_v58, %v194_v62  ;;  %v293_v35 = vadd.f32 %v292_v26, %v291_v29  ;;  %v308_v59 = vsel %vm147_vm0, %v247_v52, 0.0 }
  0x49   : > { %v198_v10 = vadd.f32 %v197_v0, %v196_v4  ;;  %v295_v40 = vadd.f32 %v294_v32, %v293_v35 }
  0x4b   : > { %v200_v16 = vadd.f32 %v199_v6, %v198_v10  ;;  %v297_v44 = vadd.f32 %v296_v38, %v295_v40 }
  0x4d   : > { %v202_v22 = vadd.f32 %v201_v12, %v200_v16  ;;  %v299_v47 = vadd.f32 %v298_v42, %v297_v44 }
  0x4f   : > { %v204_v28 = vadd.f32 %v203_v18, %v202_v22  ;;  %v301_v51 = vadd.f32 %v300_v46, %v299_v47 }
  0x51   : > { %v206_v34 = vadd.f32 %v205_v24, %v204_v28  ;;  %v303_v54 = vadd.f32 %v302_v49, %v301_v51 }
  0x53   : > { %v208_v39 = vadd.f32 %v207_v30, %v206_v34  ;;  %v305_v58 = vadd.f32 %v304_v53, %v303_v54 }
  0x55   : > { %v210_v43 = vadd.f32 %v209_v36, %v208_v39  ;;  %v307_v60 = vadd.f32 %v306_v56, %v305_v58 }
  0x57   : > { %v211_v50 = vrot.slane %v210_v43, 4  ;;  %v309_v63 = vadd.f32 %v308_v59, %v307_v60 }
  0x59   : > { %v212_v57 = vadd.f32 %v211_v50, %v210_v43  ;;  %v311_v0 = vadd.f32 %v310_v61, %v309_v63 }
  0x5b   : > { %v213_v62 = vrot.slane %v212_v57, 2  ;;  %v312_v2 = vrot.slane %v311_v0, 4 }
  0x5d   : > { %v214_v1 = vadd.f32 %v213_v62, %v212_v57  ;;  %v313_v3 = vadd.f32 %v312_v2, %v311_v0 }
  0x5f   : > { %v215_v4 = vrot.slane %v214_v1, 1  ;;  %v314_v5 = vrot.slane %v313_v3, 2 }
  0x61   : > { %v315_v6 = vadd.f32 %v314_v5, %v313_v3  ;;  %v216_v7 = vadd.f32 %v215_v4, %v214_v1 }
  0x63   : > { %v316_v8 = vrot.slane %v315_v6, 1 }
  0x65   : > { %v317_v9 = vadd.f32 %v316_v8, %v315_v6 }
  0x67   : > { %v319_v10 = vsel %vm318_vm1, %v216_v7, %v317_v9 }
  0x68   : > { %321 = vst.msk [vmem:[%s109_s29] sm:$0x3] %vm320_vm2, %v319_v10 }
  0x69   : > { %475 = shalt.err (!%p472_p3)
}
  0x6a   : > { %409 = dma.vmem_to_hbm [thread:$0]  (%p560_p5), %s336_s30, 32, %s338_s2, %s323_s3  }
  0x6b PF: > { %p415_p4 = scmp.ge.s32.totalorder %s510_s9, 2  ;;  %s349_s19 = sand.u32 1, %s498_s6  }
  0x6c   : > { %s350_s20 = scalar_lea.sflag [#allocation3], %s349_s19 }
  0x6d   : > { %p412_p7 = pnand %p415_p4, %p564_p6 }
  0x6f   : > { %p413_p8 = pneg %p412_p7 }
  0x71   : > { %493 = dma.done.wait (%p413_p8), %s350_s20, 32  }
  0x72   : > { %495 = vsyncadd (%p413_p8), %s350_s20, 4294967264  ;;  %p11_p9 = scmp.ge.s32.totalorder %s547_s12, 4   ;;  %s709_s6 = smov %s502_s7 }
  0x73   : > { %s710_s7 = smov %s506_s8  ;;  %s711_s8 = smov %s558_s15 }
  0x74   : > { %s712_s9 = smov %s547_s12  ;;  %13 = sbr.rel (!%p11_p9) target bundleno = 3 (0x3), region = 59 }
  0x79   :  { %356 = vsyncpa [#allocation3], 1 }
  0x7a   :  { %358 = vsyncpa [#allocation3 + $0x1], 1 }

</bundles_post_ra>
